<compile_context>
chip_gen: v5e
topology: v5e:2x2
jax: 0.10.0
libtpu: 0.0.40
codegen_flags: <defaults>
</compile_context>

<pallas_src>
import jax
import jax.numpy as jnp
from jax import lax
from jax.experimental import pallas as pl
from jax.experimental.pallas import tpu as pltpu


IN_DIM = 20
HID1, HID2, HID3, OUT_DIM = 40, 16, 8, 4


def _leaky_relu(x, negative_slope=0.01):
    return jnp.where(x > 0, x, negative_slope * x)


def _round_up(n, m):
    return ((n + m - 1) // m) * m


def ann_mlp_kernel(x_ref,
                   w1_ref, b1_ref,
                   w2_ref, b2_ref,
                   w3_ref, b3_ref,
                   w4_ref, b4_ref,
                   o_ref):
    """One batch tile.

    x_ref : (TB, 20)  natural-layout input tile (compute dtype, bf16 by default).
    wN_ref: (out, in) weight tiles (compute dtype), VMEM-resident across steps.
    bN_ref: (out, 1)  f32 bias tiles, VMEM-resident across steps.
    o_ref : (4, TB)   lane-dense output tile.
    """
    cdt = w1_ref.dtype
    x = x_ref[...]
    if x.dtype != cdt:                      # static; normally a no-op (wrapper casts)
        x = x.astype(cdt)

    # Layer 1 (20 -> 40).  Contract on the feature axis of BOTH operands so the
    # (TB, 20) tile is consumed in its natural layout and the result lands
    # batch-on-lanes:  h[o, b] = sum_f w1[o, f] * x[b, f]   -> (40, TB).
    nt = (((1,), (1,)), ((), ()))           # lhs last dim  x  rhs last dim
    h = lax.dot_general(w1_ref[...], x, nt, preferred_element_type=jnp.float32)
    h = _leaky_relu(h + b1_ref[...])

    # Layer 2 (40 -> 16): standard (out, in) @ (in, TB) matmul, f32 accumulation.
    h = jnp.dot(w2_ref[...], h.astype(cdt), preferred_element_type=jnp.float32)
    h = _leaky_relu(h + b2_ref[...])

    # Layer 3 (16 -> 8).
    h = jnp.dot(w3_ref[...], h.astype(cdt), preferred_element_type=jnp.float32)
    h = _leaky_relu(h + b3_ref[...])

    # Layer 4 (8 -> 4) + Sigmoid.
    h = jnp.dot(w4_ref[...], h.astype(cdt), preferred_element_type=jnp.float32)
    o_ref[...] = jax.nn.sigmoid(h + b4_ref[...]).astype(o_ref.dtype)


def ann_model_forward(x, params, *, block_b=16384,
                      compute_dtype=jnp.bfloat16, out_dtype=jnp.float32):
    """Forward pass of ANNModel (eval semantics: dropout = identity).

    x            : (B, 20) array, consumed in its natural layout (no host
                   transpose / pad passes over x).
    params       : dict name -> (w, b), w in PyTorch-native (out, in) layout.
    block_b      : batch tile size (default 16384; sweep 8K-32K per chip gen).
    compute_dtype: dtype fed to the MXU for x / weights / inter-layer
                   activations (accumulation, bias add and activations stay
                   f32).  bf16 (default) halves the x HBM read and avoids
                   multi-pass f32 MXU lowering; pass jnp.float32 for exact-f32.
    Returns (B, 4) array of `out_dtype`.
    """
    (w1, b1), (w2, b2), (w3, b3), (w4, b4) = (
        params["linin"], params["layer2"], params["layer3"], params["layer4"]
    )
    B, feat = x.shape
    assert feat == IN_DIM

    # Cast x to the compute dtype.  When x is produced by an upstream op, XLA
    # fuses this cast for free; callers can also hand in bf16 x directly.
    if compute_dtype is not None and x.dtype != compute_dtype:
        x = x.astype(compute_dtype)
    cdt = x.dtype if compute_dtype is None else compute_dtype

    # ---- batch tile selection ----------------------------------------------
    # Big tiles amortise per-grid-step overhead.  Cap so that
    #   * large batches get >= 2 blocks (v7x: keeps both TensorCores busy), and
    #   * TB is a multiple of 128 (lane-dense intermediates / output tile),
    #     unless the whole batch fits in one exact-size block.
    TB = max(128, int(block_b))
    if B > 2048:
        TB = min(TB, _round_up(pl.cdiv(B, 2), 128))
    TB = _round_up(min(TB, _round_up(B, 128)), 128)
    if TB >= B:
        TB = B                                  # single exact block (any B)
    n_blocks = pl.cdiv(B, TB)

    # Weights in compute dtype; biases as f32 (out, 1) for clean broadcasting.
    w1c, w2c, w3c, w4c = (w.astype(cdt) for w in (w1, w2, w3, w4))
    b1c, b2c, b3c, b4c = (b.reshape(-1, 1).astype(jnp.float32)
                          for b in (b1, b2, b3, b4))

    # Constant index_map => weights/biases stay VMEM-resident across grid steps.
    def resident(a):
        return pl.BlockSpec(a.shape, lambda i: (0, 0))

    out_t = pl.pallas_call(
        ann_mlp_kernel,
        out_shape=jax.ShapeDtypeStruct((OUT_DIM, B), out_dtype),
        grid=(n_blocks,),
        in_specs=[
            pl.BlockSpec((TB, IN_DIM), lambda i: (i, 0)),     # x: natural layout
            resident(w1c), resident(b1c),
            resident(w2c), resident(b2c),
            resident(w3c), resident(b3c),
            resident(w4c), resident(b4c),
        ],
        out_specs=pl.BlockSpec((OUT_DIM, TB), lambda i: (0, i)),   # lane-dense
        compiler_params=pltpu.CompilerParams(
            dimension_semantics=("parallel",),       # shard tiles across v7x's 2 TCs
            vmem_limit_bytes=64 * 1024 * 1024,       # big tiles fit on v5e/v6e/v7x
        ),
    )(x, w1c, b1c, w2c, b2c, w3c, b3c, w4c, b4c)

    # (4, B) -> (B, 4): tiny 16 B/row wrapper pass; the bulk of the HBM traffic
    # (x) is already consumed in natural layout by the kernel.
    return jnp.transpose(out_t)


def init_params(key):
    """Deterministic init mimicking nn.Linear: w is PyTorch-native (out, in)."""
    dims = [("linin", IN_DIM, HID1), ("layer2", HID1, HID2),
            ("layer3", HID2, HID3), ("layer4", HID3, OUT_DIM)]
    params = {}
    for name, fan_in, fan_out in dims:
        key, kw, kb = jax.random.split(key, 3)
        bound = 1.0 / jnp.sqrt(fan_in)
        w = jax.random.uniform(kw, (fan_out, fan_in), jnp.float32, -bound, bound)
        b = jax.random.uniform(kb, (fan_out,), jnp.float32, -bound, bound)
        params[name] = (w, b)
    return params


def _reference_forward(x, params, compute_dtype=jnp.float32):
    """Pure-JAX reference emulating the kernel's precision pathway."""
    cdt = compute_dtype
    h = x.astype(cdt)
    for name in ("linin", "layer2", "layer3"):
        w, b = params[name]
        h = jnp.dot(h, w.astype(cdt).T, preferred_element_type=jnp.float32,
                    precision=lax.Precision.HIGHEST) + b
        h = _leaky_relu(h).astype(cdt)
    w, b = params["layer4"]
    h = jnp.dot(h, w.astype(cdt).T, preferred_element_type=jnp.float32,
                precision=lax.Precision.HIGHEST) + b
    return jax.nn.sigmoid(h)


if __name__ == "__main__":
    key = jax.random.PRNGKey(0)
    kx, kx2, kp = jax.random.split(key, 3)
    params = init_params(kp)

    # 1) Small batch, exact-f32 compute path: single block, tight check.
    x = jax.random.normal(kx, (8, IN_DIM), jnp.float32)
    out = jax.block_until_ready(
        ann_model_forward(x, params, compute_dtype=jnp.float32))
    ref = _reference_forward(x, params, jnp.float32)
    assert out.shape == (8, OUT_DIM)
    assert jnp.allclose(out, ref, atol=1e-3, rtol=1e-3), \
        float(jnp.max(jnp.abs(out - ref)))

    # 2) Multi-block ragged batch: 300 rows, TB=128 -> grid=(3,), last block partial.
    x2 = jax.random.normal(kx2, (300, IN_DIM), jnp.float32)
    out2 = jax.block_until_ready(
        ann_model_forward(x2, params, block_b=128, compute_dtype=jnp.float32))
    ref2 = _reference_forward(x2, params, jnp.float32)
    assert out2.shape == (300, OUT_DIM)
    assert jnp.allclose(out2, ref2, atol=1e-3, rtol=1e-3), \
        float(jnp.max(jnp.abs(out2 - ref2)))

    # 3) Default fast path: bf16 x / weights (f32 accumulation), default big tile.
    out3 = jax.block_until_ready(ann_model_forward(x2, params))
    ref3 = _reference_forward(x2, params, jnp.bfloat16)
    assert out3.shape == (300, OUT_DIM)
    assert jnp.allclose(out3, ref3, atol=5e-3, rtol=5e-3), \
        float(jnp.max(jnp.abs(out3 - ref3)))
    # Loose sanity check against the pure-f32 reference.
    assert jnp.allclose(out3, ref2, atol=6e-2, rtol=6e-2)

    print("KERNEL_OK")
</pallas_src>

<mosaic_0001>
module attributes {stable_mosaic.version = 11 : i64} {
  func.func @ann_mlp_kernel(%arg0: i32, %arg1: memref<8x20xf32, #tpu.memory_space<vmem>>, %arg2: memref<40x20xf32, #tpu.memory_space<vmem>>, %arg3: memref<40x1xf32, #tpu.memory_space<vmem>>, %arg4: memref<16x40xf32, #tpu.memory_space<vmem>>, %arg5: memref<16x1xf32, #tpu.memory_space<vmem>>, %arg6: memref<8x16xf32, #tpu.memory_space<vmem>>, %arg7: memref<8x1xf32, #tpu.memory_space<vmem>>, %arg8: memref<4x8xf32, #tpu.memory_space<vmem>>, %arg9: memref<4x1xf32, #tpu.memory_space<vmem>>, %arg10: memref<4x8xf32, #tpu.memory_space<vmem>>) attributes {dimension_semantics = [#tpu.dimension_semantics<parallel>], iteration_bounds = array<i64: 1>, scalar_prefetch = 0 : i64, scratch_operands = 0 : i64, tpu.core_type = #tpu.core_type<tc>, window_params = [{transform_indices = @transform_0, window_bounds = array<i64: 8, 20>}, {pipeline_mode = #tpu.pipeline_mode<synchronous>, transform_indices = @transform_1, window_bounds = array<i64: 40, 20>}, {pipeline_mode = #tpu.pipeline_mode<synchronous>, transform_indices = @transform_2, window_bounds = array<i64: 40, 1>}, {pipeline_mode = #tpu.pipeline_mode<synchronous>, transform_indices = @transform_3, window_bounds = array<i64: 16, 40>}, {pipeline_mode = #tpu.pipeline_mode<synchronous>, transform_indices = @transform_4, window_bounds = array<i64: 16, 1>}, {pipeline_mode = #tpu.pipeline_mode<synchronous>, transform_indices = @transform_5, window_bounds = array<i64: 8, 16>}, {pipeline_mode = #tpu.pipeline_mode<synchronous>, transform_indices = @transform_6, window_bounds = array<i64: 8, 1>}, {pipeline_mode = #tpu.pipeline_mode<synchronous>, transform_indices = @transform_7, window_bounds = array<i64: 4, 8>}, {pipeline_mode = #tpu.pipeline_mode<synchronous>, transform_indices = @transform_8, window_bounds = array<i64: 4, 1>}, {transform_indices = @transform_9, window_bounds = array<i64: 4, 8>}]} {
    %c0 = arith.constant 0 : index
    %c0_0 = arith.constant 0 : index
    %0 = vector.load %arg1[%c0, %c0_0] : memref<8x20xf32, #tpu.memory_space<vmem>>, vector<8x20xf32>
    %c0_1 = arith.constant 0 : index
    %c0_2 = arith.constant 0 : index
    %1 = vector.load %arg2[%c0_1, %c0_2] : memref<40x20xf32, #tpu.memory_space<vmem>>, vector<40x20xf32>
    %cst = arith.constant dense<0.000000e+00> : vector<40x8xf32>
    %2 = tpu.matmul %1, %0, %cst {dimension_numbers = #tpu.dot_dimension_numbers<[1], [1], [0], [0], [0, 0, 1, 0], [], []>} : vector<40x20xf32>, vector<8x20xf32>, vector<40x8xf32> -> vector<40x8xf32>
    %c0_3 = arith.constant 0 : index
    %c0_4 = arith.constant 0 : index
    %3 = vector.load %arg3[%c0_3, %c0_4] : memref<40x1xf32, #tpu.memory_space<vmem>>, vector<40x1xf32>
    %4 = vector.broadcast %3 : vector<40x1xf32> to vector<40x8xf32>
    %5 = arith.addf %2, %4 : vector<40x8xf32>
    %cst_5 = arith.constant 0.000000e+00 : f32
    %6 = vector.broadcast %cst_5 : f32 to vector<40x8xf32>
    %7 = arith.cmpf ogt, %5, %6 : vector<40x8xf32>
    %cst_6 = arith.constant 0.00999999977 : f32
    %8 = vector.broadcast %cst_6 : f32 to vector<40x8xf32>
    %9 = arith.mulf %8, %5 : vector<40x8xf32>
    %10 = arith.select %7, %5, %9 : vector<40x8xi1>, vector<40x8xf32>
    %c0_7 = arith.constant 0 : index
    %c0_8 = arith.constant 0 : index
    %11 = vector.load %arg4[%c0_7, %c0_8] : memref<16x40xf32, #tpu.memory_space<vmem>>, vector<16x40xf32>
    %cst_9 = arith.constant dense<0.000000e+00> : vector<16x8xf32>
    %12 = tpu.matmul %11, %10, %cst_9 {dimension_numbers = #tpu.dot_dimension_numbers<[1], [0], [0], [1], [0, 0, 1, 1], [], []>} : vector<16x40xf32>, vector<40x8xf32>, vector<16x8xf32> -> vector<16x8xf32>
    %c0_10 = arith.constant 0 : index
    %c0_11 = arith.constant 0 : index
    %13 = vector.load %arg5[%c0_10, %c0_11] : memref<16x1xf32, #tpu.memory_space<vmem>>, vector<16x1xf32>
    %14 = vector.broadcast %13 : vector<16x1xf32> to vector<16x8xf32>
    %15 = arith.addf %12, %14 : vector<16x8xf32>
    %cst_12 = arith.constant 0.000000e+00 : f32
    %16 = vector.broadcast %cst_12 : f32 to vector<16x8xf32>
    %17 = arith.cmpf ogt, %15, %16 : vector<16x8xf32>
    %cst_13 = arith.constant 0.00999999977 : f32
    %18 = vector.broadcast %cst_13 : f32 to vector<16x8xf32>
    %19 = arith.mulf %18, %15 : vector<16x8xf32>
    %20 = arith.select %17, %15, %19 : vector<16x8xi1>, vector<16x8xf32>
    %c0_14 = arith.constant 0 : index
    %c0_15 = arith.constant 0 : index
    %21 = vector.load %arg6[%c0_14, %c0_15] : memref<8x16xf32, #tpu.memory_space<vmem>>, vector<8x16xf32>
    %cst_16 = arith.constant dense<0.000000e+00> : vector<8x8xf32>
    %22 = tpu.matmul %21, %20, %cst_16 {dimension_numbers = #tpu.dot_dimension_numbers<[1], [0], [0], [1], [0, 0, 1, 1], [], []>} : vector<8x16xf32>, vector<16x8xf32>, vector<8x8xf32> -> vector<8x8xf32>
    %c0_17 = arith.constant 0 : index
    %c0_18 = arith.constant 0 : index
    %23 = vector.load %arg7[%c0_17, %c0_18] : memref<8x1xf32, #tpu.memory_space<vmem>>, vector<8x1xf32>
    %24 = vector.broadcast %23 : vector<8x1xf32> to vector<8x8xf32>
    %25 = arith.addf %22, %24 : vector<8x8xf32>
    %cst_19 = arith.constant 0.000000e+00 : f32
    %26 = vector.broadcast %cst_19 : f32 to vector<8x8xf32>
    %27 = arith.cmpf ogt, %25, %26 : vector<8x8xf32>
    %cst_20 = arith.constant 0.00999999977 : f32
    %28 = vector.broadcast %cst_20 : f32 to vector<8x8xf32>
    %29 = arith.mulf %28, %25 : vector<8x8xf32>
    %30 = arith.select %27, %25, %29 : vector<8x8xi1>, vector<8x8xf32>
    %c0_21 = arith.constant 0 : index
    %c0_22 = arith.constant 0 : index
    %31 = vector.load %arg8[%c0_21, %c0_22] : memref<4x8xf32, #tpu.memory_space<vmem>>, vector<4x8xf32>
    %cst_23 = arith.constant dense<0.000000e+00> : vector<4x8xf32>
    %32 = tpu.matmul %31, %30, %cst_23 {dimension_numbers = #tpu.dot_dimension_numbers<[1], [0], [0], [1], [0, 0, 1, 1], [], []>} : vector<4x8xf32>, vector<8x8xf32>, vector<4x8xf32> -> vector<4x8xf32>
    %c0_24 = arith.constant 0 : index
    %c0_25 = arith.constant 0 : index
    %33 = vector.load %arg9[%c0_24, %c0_25] : memref<4x1xf32, #tpu.memory_space<vmem>>, vector<4x1xf32>
    %34 = vector.broadcast %33 : vector<4x1xf32> to vector<4x8xf32>
    %35 = arith.addf %32, %34 : vector<4x8xf32>
    %36 = arith.negf %35 : vector<4x8xf32>
    %37 = math.exp %36 : vector<4x8xf32>
    %cst_26 = arith.constant 1.000000e+00 : f32
    %38 = vector.broadcast %cst_26 : f32 to vector<4x8xf32>
    %39 = arith.addf %38, %37 : vector<4x8xf32>
    %40 = arith.divf %38, %39 : vector<4x8xf32>
    %c0_27 = arith.constant 0 : index
    %c0_28 = arith.constant 0 : index
    %41 = vector.load %arg10[%c0_27, %c0_28] : memref<4x8xf32, #tpu.memory_space<vmem>>, vector<4x8xf32>
    tpu.vector_store %arg10[%c0_27, %c0_28], %40 {strides = array<i32>} : memref<4x8xf32, #tpu.memory_space<vmem>>, vector<4x8xf32>,
    return
  }
  func.func @transform_0(%arg0: i32) -> (i32, i32) {
    %c0_i32 = arith.constant 0 : i32
    %c0_i32_0 = arith.constant 0 : i32
    return %arg0, %c0_i32 : i32, i32
  }
  func.func @transform_1(%arg0: i32) -> (i32, i32) {
    %c0_i32 = arith.constant 0 : i32
    %c0_i32_0 = arith.constant 0 : i32
    %c0_i32_1 = arith.constant 0 : i32
    return %c0_i32, %c0_i32_0 : i32, i32
  }
  func.func @transform_2(%arg0: i32) -> (i32, i32) {
    %c0_i32 = arith.constant 0 : i32
    %c0_i32_0 = arith.constant 0 : i32
    %c0_i32_1 = arith.constant 0 : i32
    return %c0_i32, %c0_i32_0 : i32, i32
  }
  func.func @transform_3(%arg0: i32) -> (i32, i32) {
    %c0_i32 = arith.constant 0 : i32
    %c0_i32_0 = arith.constant 0 : i32
    %c0_i32_1 = arith.constant 0 : i32
    return %c0_i32, %c0_i32_0 : i32, i32
  }
  func.func @transform_4(%arg0: i32) -> (i32, i32) {
    %c0_i32 = arith.constant 0 : i32
    %c0_i32_0 = arith.constant 0 : i32
    %c0_i32_1 = arith.constant 0 : i32
    return %c0_i32, %c0_i32_0 : i32, i32
  }
  func.func @transform_5(%arg0: i32) -> (i32, i32) {
    %c0_i32 = arith.constant 0 : i32
    %c0_i32_0 = arith.constant 0 : i32
    %c0_i32_1 = arith.constant 0 : i32
    return %c0_i32, %c0_i32_0 : i32, i32
  }
  func.func @transform_6(%arg0: i32) -> (i32, i32) {
    %c0_i32 = arith.constant 0 : i32
    %c0_i32_0 = arith.constant 0 : i32
    %c0_i32_1 = arith.constant 0 : i32
    return %c0_i32, %c0_i32_0 : i32, i32
  }
  func.func @transform_7(%arg0: i32) -> (i32, i32) {
    %c0_i32 = arith.constant 0 : i32
    %c0_i32_0 = arith.constant 0 : i32
    %c0_i32_1 = arith.constant 0 : i32
    return %c0_i32, %c0_i32_0 : i32, i32
  }
  func.func @transform_8(%arg0: i32) -> (i32, i32) {
    %c0_i32 = arith.constant 0 : i32
    %c0_i32_0 = arith.constant 0 : i32
    %c0_i32_1 = arith.constant 0 : i32
    return %c0_i32, %c0_i32_0 : i32, i32
  }
  func.func @transform_9(%arg0: i32) -> (i32, i32) {
    %c0_i32 = arith.constant 0 : i32
    %c0_i32_0 = arith.constant 0 : i32
    return %c0_i32, %arg0 : i32, i32
  }
}

</mosaic_0001>

<bundles_post_ra>
// kernel: tpu_custom_call.1
= control target key start
LH: loop header
LB: loop body
LE: loop exit
PB: predicated region body
PF: predicated region fallthrough
CT: control target
= control target key end

     0   :  { %vm69_vm0 = vcmask 162816   ;;  %v334_v5 = vmov 0   ;;  %s453_s0 = inlined_call_operand.vmem [shape: f32[8,20], index: 0, kind: input, shape index: {}]   ;;  %s454_s1 = inlined_call_operand.vmem [shape: f32[40,20], index: 1, kind: input, shape index: {}]   ;;  %s455_s2 = inlined_call_operand.vmem [shape: f32[40,1], index: 2, kind: input, shape index: {}]   ;;  %s456_s3 = inlined_call_operand.vmem [shape: f32[16,40], index: 3, kind: input, shape index: {}]   ;;  %s457_s4 = inlined_call_operand.vmem [shape: f32[16,1], index: 4, kind: input, shape index: {}]   ;;  %s458_s5 = inlined_call_operand.vmem [shape: f32[8,16], index: 5, kind: input, shape index: {}]   ;;  %s459_s6 = inlined_call_operand.vmem [shape: f32[8,1], index: 6, kind: input, shape index: {}]   ;;  %s460_s7 = inlined_call_operand.vmem [shape: f32[4,8], index: 7, kind: input, shape index: {}]   ;;  %s461_s8 = inlined_call_operand.vmem [shape: f32[4,1], index: 8, kind: input, shape index: {}]   ;;  %s462_s9 = inlined_call_operand.hbm [shape: f32[4,8], index: 9, kind: output, shape index: {}]  }
   0x1   :  { %v33_v0 = vld [vmem:[%s453_s0] sm:$0xff]  ;;  %v37_v2 = vld [vmem:[%s454_s1 + $0x18] sm:$0xff]  ;;  %v41_v4 = vld [vmem:[%s455_s2 + $0x10] sm:$0xff]  ;;  %301 = vset.pattern.permute.xlu0 %v334_v5  ;;  %302 = vset.pattern.permute.xlu1 %v334_v5 }
   0x2   :  { %v34_v1 = vld [vmem:[%s454_s1] sm:$0xff]  ;;  %287 = vmatpush.xpose.msk.msra.mxu0 %vm69_vm0, %v33_v0  ;;  %298 = vmatpush.xpose.msk.msra.mxu3 %vm69_vm0, %v33_v0 }
   0x3   :  { %v43_v3 = vld [vmem:[%s455_s2 + $0x20] sm:$0xff]  ;;  %56 = vperm.xlu1 %302, %v41_v4   ;;  %303 = vset.pattern.permute.xlu2 %v334_v5 }
   0x4   :  { %66 = vperm.xlu0 %301, %v43_v3   ;;  %v39_v6 = vld [vmem:[%s455_s2] sm:$0xff] }
   0x5   :  { %288 = vmatmul.msk.f32.vlgmr.msra.gmra.mxu0 %vm69_vm0, %v34_v1  ;;  %291 = vmatmul.msk.f32.vlgmr.msra.gmra.mxu3 %vm69_vm0, %v37_v2 }
   0x6   :  { %14 = vsyncpa [#allocation3], 0  ;;  %46 = vperm.xlu2 %303, %v39_v6   ;;  %v42_v7 = vld [vmem:[%s455_s2 + $0x18] sm:$0xff]  ;;  %v40_v8 = vld [vmem:[%s455_s2 + $0x8] sm:$0xff]  ;;  %vm149_vm6 = vcmask 326656   ;;  %vm192_vm9 = vcmask 130048  }
   0x7   :  { %v35_v9 = vld [vmem:[%s454_s1 + $0x8] sm:$0xff]  ;;  %v38_v10 = vld [vmem:[%s454_s1 + $0x20] sm:$0xff]  ;;  %v36_v14 = vld [vmem:[%s454_s1 + $0x10] sm:$0xff]  ;;  %vm226_vm11 = vcmask 64512   ;;  %s278_s20 = sshll.u32 %s462_s9, 4  ;;  %vm269_vm15 = vcmask 60416   ;;  %s279_s20 = int_to_ptr.hbm [resolvable:$true] %s278_s20 }
   0x8   :  { %v138_v11 = vld [vmem:[%s457_s4 + $0x8] sm:$0xff]  ;;  %v137_v12 = vld [vmem:[%s457_s4] sm:$0xff] }
   0x9   :  { %v186_v13 = vld [vmem:[%s459_s6] sm:$0xff]  ;;  %v136_v42 = vld [vmem:[%s456_s3 + $0x8] sm:$0xff] }
   0xa   :  { %v220_v15 = vld [vmem:[%s461_s8] sm:$0xf] }
   0xb   :  { %51 = vperm.xlu1 %302, %v40_v8   ;;  %v135_v40 = vld [vmem:[%s456_s3] sm:$0xff] }
   0xc   :  { %61 = vperm.xlu0 %301, %v42_v7   ;;  %v185_v52 = vld [vmem:[%s458_s5] sm:$0xff]  ;;  %s335_s5 = smov [#allocation2]  }
   0xd   :  { %289 = vmatmul.msk.f32.gmra.mxu0 %vm69_vm0, %v35_v9  ;;  %292 = vmatmul.msk.f32.gmra.mxu3 %vm69_vm0, %v38_v10  ;;  %v219_v58 = vld [vmem:[%s460_s7] sm:$0xf]  ;;  %s276_s7 = sshll.u32 %s335_s5, 4  ;;  %s277_s7 = int_to_ptr.vmem [resolvable:$true] %s276_s7 }
   0xe   :  { %146 = vperm.xlu2 %303, %v138_v11  }
  0x13   :  { %189 = vperm.xlu1 %302, %v186_v13  }
  0x14   :  { %141 = vperm.xlu0 %301, %v137_v12  }
  0x15   :  { %290 = vmatmul.msk.f32.gmra.mxu0 %vm69_vm0, %v36_v14 }
  0x16   :  { %223 = vperm.xlu2 %303, %v220_v15  }
  0x60   :  { %v47_v26 = vpop.permute.xlu2 %46 }
  0x68   :  { %v147_v46 = vpop.permute.xlu2 %146 }
  0x70   :  { %v224_v60 = vpop.permute.xlu2 %223 }
  0x75   :  { %v57_v18 = vpop.permute.xlu1 %56 }
  0x76   :  { %v67_v17 = vpop.permute.xlu0 %66 }
  0x7d   :  { %v52_v24 = vpop.permute.xlu1 %51 }
  0x7e   :  { %v62_v21 = vpop.permute.xlu0 %61 }
  0x82   :  { %v105_v16 = vpop.f32.mrf.mxu0 }
  0x83   :  { %v106_v32 = vadd.f32 %v105_v16, %v47_v26 }
  0x85   :  { %v125_v38 = vmul.f32 0.01, %v106_v32  ;;  %vm120_vm5 = vcmp.gt.f32.partialorder %v106_v32, 0.0  ;;  %v190_v54 = vpop.permute.xlu1 %189 }
  0x86   :  { %v142_v44 = vpop.permute.xlu0 %141 }
  0x87   :  { %v130_v41 = vsel %vm120_vm5, %v106_v32, %v125_v38 }
  0x88   :  { %v114_v19 = vpop.f32.mrf.mxu3 }
  0x89   :  { %v115_v22 = vadd.f32 %v114_v19, %v62_v21 }
  0x8a   :  { %v108_v20 = vpop.f32.mrf.mxu0 }
  0x8b   :  { %v109_v27 = vadd.f32 %v108_v20, %v52_v24  ;;  %v128_v31 = vmul.f32 0.01, %v115_v22  ;;  %vm123_vm2 = vcmp.gt.f32.partialorder %v115_v22, 0.0 }
  0x8d   :  { %v133_v35 = vsel %vm123_vm2, %v115_v22, %v128_v31  ;;  %v126_v36 = vmul.f32 0.01, %v109_v27  ;;  %vm121_vm4 = vcmp.gt.f32.partialorder %v109_v27, 0.0 }
  0x8f   :  { %v131_v39 = vsel %vm121_vm4, %v109_v27, %v126_v36 }
  0x90   :  { %v117_v23 = vpop.f32.mrf.mxu3 }
  0x91   :  { %v118_v25 = vadd.f32 %v117_v23, %v67_v17 }
  0x92   :  { %v111_v28 = vpop.f32.mrf.mxu0 }
  0x93   :  { %v112_v29 = vadd.f32 %v111_v28, %v57_v18  ;;  %vm124_vm1 = vcmp.gt.f32.partialorder %v118_v25, 0.0  ;;  %v129_v30 = vmul.f32 0.01, %v118_v25 }
  0x95   :  { %v134_v33 = vsel %vm124_vm1, %v118_v25, %v129_v30  ;;  %v127_v34 = vmul.f32 0.01, %v112_v29  ;;  %vm122_vm3 = vcmp.gt.f32.partialorder %v112_v29, 0.0 }
  0x96   :  { %167 = vmatpush.msra.mxu1 %v134_v33 }
  0x97   :  { %v132_v37 = vsel %vm122_vm3, %v112_v29, %v127_v34 }
  0x98   :  { %168 = vmatpush.msra.mxu1 %v133_v35 }
  0x9a   :  { %169 = vmatpush.msra.mxu1 %v132_v37 }
  0x9c   :  { %170 = vmatpush.msra.mxu1 %v131_v39 }
  0x9e   :  { %171 = vmatpush.msra.mxu1 %v130_v41 }
  0x9f   :  { %293 = vmatmul.msk.f32.vlgmr.msra.gmra.mxu1 %vm149_vm6, %v135_v40 }
  0xa7   :  { %294 = vmatmul.msk.f32.gmra.mxu1 %vm149_vm6, %v136_v42 }
 0x11c   :  { %v173_v43 = vpop.f32.mrf.mxu1 }
 0x11d   :  { %v174_v45 = vadd.f32 %v173_v43, %v142_v44 }
 0x11f   :  { %v181_v50 = vmul.f32 0.01, %v174_v45  ;;  %vm179_vm8 = vcmp.gt.f32.partialorder %v174_v45, 0.0 }
 0x121   :  { %v183_v53 = vsel %vm179_vm8, %v174_v45, %v181_v50 }
 0x124   :  { %v176_v47 = vpop.f32.mrf.mxu1 }
 0x125   :  { %v177_v48 = vadd.f32 %v176_v47, %v147_v46 }
 0x127   :  { %vm180_vm7 = vcmp.gt.f32.partialorder %v177_v48, 0.0  ;;  %v182_v49 = vmul.f32 0.01, %v177_v48 }
 0x129   :  { %v184_v51 = vsel %vm180_vm7, %v177_v48, %v182_v49 }
 0x12a   :  { %210 = vmatpush.msra.mxu2 %v184_v51 }
 0x12c   :  { %211 = vmatpush.msra.mxu2 %v183_v53 }
 0x12d   :  { %295 = vmatmul.msk.f32.vlgmr.msra.gmra.mxu2 %vm192_vm9, %v185_v52 }
 0x1b0   :  { %v213_v55 = vpop.f32.mrf.mxu2 }
 0x1b1   :  { %v214_v56 = vadd.f32 %v213_v55, %v190_v54 }
 0x1b3   :  { %vm216_vm10 = vcmp.gt.f32.partialorder %v214_v56, 0.0  ;;  %v217_v57 = vmul.f32 0.01, %v214_v56 }
 0x1b5   :  { %v218_v59 = vsel %vm216_vm10, %v214_v56, %v217_v57 }
 0x1b6   :  { %245 = vmatpush.msrb.mxu3 %v218_v59 }
 0x1b7   :  { %296 = vmatmul.msk.f32.vlgmr.msrb.gmra.mxu3 %vm226_vm11, %v219_v58 }
 0x23a   :  { %v247_v61 = vpop.f32.mrf.mxu3 }
 0x23b   :  { %v248_v62 = vadd.f32 %v247_v61, %v224_v60 }
 0x23d   :  { %v297_v63 = vmul.f32 -1.442695, %v248_v62 }
 0x23f   :  { %304 = vpow2.f32 %v297_v63 }
 0x245   :  { %v305_v0 = vpop.eup %304 }
 0x246   :  { %v253_v1 = vadd.f32 1.0, %v305_v0 }
 0x248   :  { %306 = vrcp.f32 %v253_v1  ;;  %v265_v5 = vand.u32 2147483648, %v253_v1  ;;  %v263_v7 = vand.u32 2147483647, %v253_v1  ;;  %vm259_vm13 = vweird.f32 %v253_v1 }
 0x24a   :  { %v266_v9 = vor.u32 1.1754944e-38, %v265_v5  ;;  %vm264_vm0 = vcmp.eq.f32.partialorder %v263_v7, 8.507059e+37 }
 0x24e   :  { %v307_v2 = vpop.eup %306 }
 0x24f   :  { %v255_v3 = vmul.f32 %v307_v2, %v253_v1  ;;  %vm260_vm12 = vweird.f32 %v307_v2 }
 0x250   :  { %vm261_vm14 = vmor %vm259_vm13, %vm260_vm12 }
 0x251   :  { %v256_v4 = vsub.f32 1.0, %v255_v3 }
 0x253   :  { %v257_v6 = vmul.f32 %v307_v2, %v256_v4 }
 0x255   :  { %v258_v8 = vadd.f32 %v307_v2, %v257_v6 }
 0x257   :  { %v262_v10 = vsel %vm261_vm14, %v307_v2, %v258_v8 }
 0x258   :  { %v267_v11 = vsel %vm264_vm0, %v266_v9, %v262_v10 }
 0x259   :  { %270 = vst.msk [vmem:[#allocation2] sm:$0xf] %vm269_vm15, %v267_v11 }
 0x25a   :  { %281 = dma.vmem_to_hbm [thread:$0]  %s277_s7, 64, %s279_s20, [#allocation3]  }
 0x25b   :  { %332 = dma.done.wait [#allocation3], 64  }
 0x25c   :  { %333 = vsyncadd [#allocation3], 4294967232 }
 0x25d   :  { %286 = vsyncpa [#allocation3], 1 }

</bundles_post_ra>
